<compile_context>
chip_gen: v7x
topology: tpu7x:2x2x1
jax: 0.10.0
libtpu: 0.0.40
codegen_flags: <defaults>
</compile_context>

<pallas_src>
import math
import jax
import jax.numpy as jnp
from jax.experimental import pallas as pl
from jax.experimental.pallas import tpu as pltpu


def _round_up(a, b):
    return ((a + b - 1) // b) * b


# ----------------------------------------------------------------------------
# Chip profile: per-generation row-tile target + VMEM budget.
# ----------------------------------------------------------------------------
def _chip_profile():
    kind = ""
    try:
        kind = jax.devices()[0].device_kind.lower()
    except Exception:
        pass
    vmem_phys = None
    try:
        info = pltpu.get_tpu_info()
        vmem_phys = int(getattr(info, "vmem_capacity_bytes"))
    except Exception:
        vmem_phys = None

    MiB = 1024 * 1024
    if "v7" in kind:
        phys = vmem_phys or 64 * MiB
        # 64 MiB physical per TC: stay well below it (compiler-internal scratch
        # for the h intermediate + bf16 copies is not pipeline-managed).
        return dict(name="v7x", tm_target=768, tn_target=256,
                    vmem_cap=min(int(phys * 0.80), 52 * MiB), megacore=True)
    if "v6" in kind:
        phys = vmem_phys or 128 * MiB
        return dict(name="v6e", tm_target=1024, tn_target=512,
                    vmem_cap=min(int(phys * 0.80), 100 * MiB), megacore=False)
    if "v5" in kind:
        phys = vmem_phys or 128 * MiB
        return dict(name="v5e", tm_target=512, tn_target=512,
                    vmem_cap=min(int(phys * 0.80), 100 * MiB), megacore=False)
    # Unknown generation: conservative budget that still double-buffers.
    phys = vmem_phys or 64 * MiB
    return dict(name="unknown", tm_target=512, tn_target=512,
                vmem_cap=min(int(phys * 0.75), 48 * MiB), megacore=False)


def ffn_config(d_model, d_ff):
    """Static tiling config for a given layer size (independent of batch)."""
    prof = _chip_profile()
    Dp = _round_up(d_model, 128)                 # lane-dense model width
    Fp128 = _round_up(d_ff, 128)
    tn_ff = min(prof["tn_target"], Fp128)        # d_ff chunk, multiple of 128
    while tn_ff > 128 and Fp128 % tn_ff:         # avoid a mostly-zero padded chunk
        tn_ff -= 128
    Fp = _round_up(d_ff, tn_ff)
    return dict(d_model=d_model, d_ff=d_ff, Dp=Dp, Fp=Fp, tn_ff=tn_ff, prof=prof)


def prepare_params(w1, b1, w2, b2, cfg):
    """Pad + cast the weights ONCE (store the result as the model's params).

    Hoisted out of the forward path so the per-call HBM traffic is only the
    activations and the weight streaming done by the kernel itself.
    """
    d_model, d_ff = cfg["d_model"], cfg["d_ff"]
    Dp, Fp = cfg["Dp"], cfg["Fp"]
    w1p = jnp.zeros((Dp, Fp), jnp.bfloat16).at[:d_model, :d_ff].set(
        w1.astype(jnp.bfloat16))
    b1p = jnp.zeros((1, Fp), jnp.float32).at[:, :d_ff].set(
        b1.reshape(1, d_ff).astype(jnp.float32))
    w2p = jnp.zeros((Fp, Dp), jnp.bfloat16).at[:d_ff, :d_model].set(
        w2.astype(jnp.bfloat16))
    b2p = jnp.zeros((1, Dp), jnp.float32).at[:, :d_model].set(
        b2.reshape(1, d_model).astype(jnp.float32))
    return w1p, b1p, w2p, b2p


def _vmem_bytes(tm, Dp, tn_ff):
    """Resident-VMEM estimate for one grid step (double-buffered pipeline)."""
    return (2 * tm * Dp * 4            # x tile (f32), double-buffered
            + tm * Dp * 2              # in-kernel bf16 copy of the x tile
            + 2 * Dp * tn_ff * 2       # W1 chunk (bf16), double-buffered
            + 2 * tn_ff * Dp * 2       # W2 chunk (bf16), double-buffered
            + 2 * tn_ff * 4            # b1 chunk
            + 2 * Dp * 4               # b2 row
            + 2 * tm * Dp * 4          # output tile (f32), double-buffered
            + tm * tn_ff * 4           # h intermediate (f32)
            + tm * tn_ff * 2)          # bf16 copy of h fed to the 2nd matmul


def _select_tm(M, cfg):
    prof, Dp, tn_ff = cfg["prof"], cfg["Dp"], cfg["tn_ff"]
    tm = min(prof["tm_target"], _round_up(M, 16))        # bf16 sublane = 16
    if prof["megacore"] and M >= 32:
        # >= 2 row tiles so both v7x TensorCores get work.
        tm = min(tm, _round_up(-(-M // 2), 16))
    tm = max(16, (tm // 16) * 16)
    while tm > 16 and _vmem_bytes(tm, Dp, tn_ff) > prof["vmem_cap"]:
        tm -= 16
    return tm


# ----------------------------------------------------------------------------
# Kernel: grid = (row tiles [parallel], d_ff chunks [arbitrary / reduction]).
# The output tile's block index is constant along j, so it stays VMEM-resident
# and doubles as the f32 accumulator (no separate scratch needed).
# ----------------------------------------------------------------------------
def ffn_kernel(x_ref, w1_ref, b1_ref, w2_ref, b2_ref, o_ref):
    j = pl.program_id(1)

    @pl.when(j == 0)
    def _init():
        # Seed the resident output tile with the linear_2 bias (broadcast row).
        o_ref[...] = jnp.zeros_like(o_ref) + b2_ref[...]

    # linear_1 chunk: (tm, Dp) bf16 @ (Dp, tn_ff) bf16 -> f32 on the MXU.
    xb = x_ref[...].astype(jnp.bfloat16)          # cast in-kernel (no host pre-pass)
    h = jnp.dot(xb, w1_ref[...], preferred_element_type=jnp.float32)
    h = jnp.maximum(h + b1_ref[...], 0.0)         # bias + ReLU in f32 on the VPU
    # TODO(synk): training-mode dropout (p=0.1) would need pltpu.prng_seed with a
    # grid-step-dependent seed + pltpu.prng_random_bits mask here; eval mode = identity.

    # linear_2 partial product, accumulated over d_ff chunks into the resident
    # f32 output tile.
    o_ref[...] += jnp.dot(h.astype(jnp.bfloat16), w2_ref[...],
                          preferred_element_type=jnp.float32)


def feed_forward(x, prepared, cfg):
    """x: (batch, seq, d_model) float32; prepared = prepare_params(...)."""
    w1p, b1p, w2p, b2p = prepared
    B, S, d_model = x.shape
    assert d_model == cfg["d_model"]
    Dp, Fp, tn_ff = cfg["Dp"], cfg["Fp"], cfg["tn_ff"]
    M = B * S
    tm = _select_tm(M, cfg)

    # Activation layout: skip the padding copy entirely in the aligned case.
    if d_model == Dp and M % tm == 0:
        x2 = x.reshape(M, d_model)
        Mp = M
    else:
        Mp = _round_up(M, tm)
        x2 = jnp.zeros((Mp, Dp), x.dtype).at[:M, :d_model].set(
            x.reshape(M, d_model))

    grid = (Mp // tm, Fp // tn_ff)
    n_i = Mp // tm

    vmem_limit = min(cfg["prof"]["vmem_cap"],
                     max(int(_vmem_bytes(tm, Dp, tn_ff) * 1.3),
                         16 * 1024 * 1024))

    cost = pl.CostEstimate(
        flops=4 * Mp * Dp * Fp,                       # two matmuls
        transcendentals=0,
        bytes_accessed=(Mp * Dp * 4                   # x read (f32)
                        + n_i * (Dp * Fp + Fp * Dp) * 2   # W1+W2 re-streamed per row tile
                        + n_i * (Fp + Dp) * 4         # biases per row tile
                        + Mp * Dp * 4))               # output write

    out2 = pl.pallas_call(
        ffn_kernel,
        out_shape=jax.ShapeDtypeStruct((Mp, Dp), jnp.float32),
        grid_spec=pltpu.PrefetchScalarGridSpec(
            num_scalar_prefetch=0,
            grid=grid,
            in_specs=[
                pl.BlockSpec((tm, Dp), lambda i, j: (i, 0)),      # x rows (resident across j)
                pl.BlockSpec((Dp, tn_ff), lambda i, j: (0, j)),   # W1 column chunk
                pl.BlockSpec((1, tn_ff), lambda i, j: (0, j)),    # b1 chunk
                pl.BlockSpec((tn_ff, Dp), lambda i, j: (j, 0)),   # W2 row chunk
                pl.BlockSpec((1, Dp), lambda i, j: (0, 0)),       # b2 (constant)
            ],
            out_specs=pl.BlockSpec((tm, Dp), lambda i, j: (i, 0)),
        ),
        compiler_params=pltpu.CompilerParams(
            dimension_semantics=("parallel", "arbitrary"),
            vmem_limit_bytes=vmem_limit),
        cost_estimate=cost,
    )(x2, w1p, b1p, w2p, b2p)

    return out2[:M, :d_model].reshape(B, S, d_model).astype(x.dtype)


def init_params(key, d_model, d_ff):
    """Deterministic init mirroring nn.Linear's uniform(-1/sqrt(fan_in), +)."""
    k1, k2, k3, k4 = jax.random.split(key, 4)
    lim1 = 1.0 / math.sqrt(d_model)
    lim2 = 1.0 / math.sqrt(d_ff)
    # stored as (in, out): kernel computes x @ W (== torch x @ W.T with W (out,in))
    w1 = jax.random.uniform(k1, (d_model, d_ff), jnp.float32, -lim1, lim1)
    b1 = jax.random.uniform(k2, (d_ff,), jnp.float32, -lim1, lim1)
    w2 = jax.random.uniform(k3, (d_ff, d_model), jnp.float32, -lim2, lim2)
    b2 = jax.random.uniform(k4, (d_model,), jnp.float32, -lim2, lim2)
    return w1, b1, w2, b2


if __name__ == "__main__":
    B, S, d_model, d_ff = 2, 8, 32, 64

    key = jax.random.PRNGKey(0)
    kx, kp = jax.random.split(key)
    x = jax.random.normal(kx, (B, S, d_model), jnp.float32)
    w1, b1, w2, b2 = init_params(kp, d_model, d_ff)

    cfg = ffn_config(d_model, d_ff)
    prepared = prepare_params(w1, b1, w2, b2, cfg)   # one-time weight prep (hoisted)

    out = jax.block_until_ready(feed_forward(x, prepared, cfg))
    assert out.shape == (B, S, d_model)

    # reference with matching numerics (bf16 matmuls, f32 accumulate, eval dropout)
    xb = x.reshape(-1, d_model).astype(jnp.bfloat16)
    h_ref = jnp.maximum(
        jnp.dot(xb, w1.astype(jnp.bfloat16), preferred_element_type=jnp.float32)
        + b1, 0.0)
    ref_bf16 = (jnp.dot(h_ref.astype(jnp.bfloat16), w2.astype(jnp.bfloat16),
                        preferred_element_type=jnp.float32)
                + b2).reshape(B, S, d_model)
    assert jnp.allclose(out, ref_bf16, atol=2e-2, rtol=2e-2)

    # also close to the full-f32 reference (bf16 matmul error only)
    ref_f32 = jnp.maximum(x @ w1 + b1, 0.0) @ w2 + b2
    assert jnp.allclose(out, ref_f32, atol=5e-2, rtol=5e-2)

    print("KERNEL_OK")
</pallas_src>

<mosaic_0001>
module attributes {stable_mosaic.version = 11 : i64} {
  func.func @ffn_kernel(%arg0: i32, %arg1: i32, %arg2: memref<16x128xf32, #tpu.memory_space<vmem>>, %arg3: memref<128x128xbf16, #tpu.memory_space<vmem>>, %arg4: memref<1x128xf32, #tpu.memory_space<vmem>>, %arg5: memref<128x128xbf16, #tpu.memory_space<vmem>>, %arg6: memref<1x128xf32, #tpu.memory_space<vmem>>, %arg7: memref<16x128xf32, #tpu.memory_space<vmem>>) attributes {dimension_semantics = [#tpu.dimension_semantics<parallel>, #tpu.dimension_semantics<arbitrary>], iteration_bounds = array<i64: 1, 1>, scalar_prefetch = 0 : i64, scratch_operands = 0 : i64, tpu.core_type = #tpu.core_type<tc>, window_params = [{transform_indices = @transform_0, window_bounds = array<i64: 16, 128>}, {transform_indices = @transform_1, window_bounds = array<i64: 128, 128>}, {transform_indices = @transform_2, window_bounds = array<i64: 1, 128>}, {transform_indices = @transform_3, window_bounds = array<i64: 128, 128>}, {pipeline_mode = #tpu.pipeline_mode<synchronous>, transform_indices = @transform_4, window_bounds = array<i64: 1, 128>}, {transform_indices = @transform_5, window_bounds = array<i64: 16, 128>}]} {
    %c0_i32 = arith.constant 0 : i32
    %0 = arith.cmpi eq, %arg1, %c0_i32 : i32
    %1 = arith.extui %0 : i1 to i32
    %c0_i32_0 = arith.constant 0 : i32
    %2 = arith.cmpi ne, %1, %c0_i32_0 : i32
    scf.if %2 {
      %cst_14 = arith.constant 0.000000e+00 : f32
      %18 = vector.broadcast %cst_14 : f32 to vector<16x128xf32>
      %c0_15 = arith.constant 0 : index
      %c0_16 = arith.constant 0 : index
      %19 = vector.load %arg6[%c0_15, %c0_16] : memref<1x128xf32, #tpu.memory_space<vmem>>, vector<1x128xf32>
      %20 = vector.broadcast %19 : vector<1x128xf32> to vector<16x128xf32>
      %21 = arith.addf %18, %20 : vector<16x128xf32>
      %c0_17 = arith.constant 0 : index
      %c0_18 = arith.constant 0 : index
      %22 = vector.load %arg7[%c0_17, %c0_18] : memref<16x128xf32, #tpu.memory_space<vmem>>, vector<16x128xf32>
      tpu.vector_store %arg7[%c0_17, %c0_18], %21 {strides = array<i32>} : memref<16x128xf32, #tpu.memory_space<vmem>>, vector<16x128xf32>,
    } else {
    }
    %c0 = arith.constant 0 : index
    %c0_1 = arith.constant 0 : index
    %3 = vector.load %arg2[%c0, %c0_1] : memref<16x128xf32, #tpu.memory_space<vmem>>, vector<16x128xf32>
    %4 = arith.truncf %3 : vector<16x128xf32> to vector<16x128xbf16>
    %c0_2 = arith.constant 0 : index
    %c0_3 = arith.constant 0 : index
    %5 = vector.load %arg3[%c0_2, %c0_3] : memref<128x128xbf16, #tpu.memory_space<vmem>>, vector<128x128xbf16>
    %cst = arith.constant dense<0.000000e+00> : vector<16x128xf32>
    %6 = tpu.matmul %4, %5, %cst {dimension_numbers = #tpu.dot_dimension_numbers<[1], [0], [0], [1], [0, 0, 1, 1], [], []>} : vector<16x128xbf16>, vector<128x128xbf16>, vector<16x128xf32> -> vector<16x128xf32>
    %c0_4 = arith.constant 0 : index
    %c0_5 = arith.constant 0 : index
    %7 = vector.load %arg4[%c0_4, %c0_5] : memref<1x128xf32, #tpu.memory_space<vmem>>, vector<1x128xf32>
    %8 = vector.broadcast %7 : vector<1x128xf32> to vector<16x128xf32>
    %9 = arith.addf %6, %8 : vector<16x128xf32>
    %cst_6 = arith.constant 0.000000e+00 : f32
    %10 = vector.broadcast %cst_6 : f32 to vector<16x128xf32>
    %11 = arith.maximumf %9, %10 : vector<16x128xf32>
    %c0_7 = arith.constant 0 : index
    %c0_8 = arith.constant 0 : index
    %12 = vector.load %arg7[%c0_7, %c0_8] : memref<16x128xf32, #tpu.memory_space<vmem>>, vector<16x128xf32>
    %13 = arith.truncf %11 : vector<16x128xf32> to vector<16x128xbf16>
    %c0_9 = arith.constant 0 : index
    %c0_10 = arith.constant 0 : index
    %14 = vector.load %arg5[%c0_9, %c0_10] : memref<128x128xbf16, #tpu.memory_space<vmem>>, vector<128x128xbf16>
    %cst_11 = arith.constant dense<0.000000e+00> : vector<16x128xf32>
    %15 = tpu.matmul %13, %14, %cst_11 {dimension_numbers = #tpu.dot_dimension_numbers<[1], [0], [0], [1], [0, 0, 1, 1], [], []>} : vector<16x128xbf16>, vector<128x128xbf16>, vector<16x128xf32> -> vector<16x128xf32>
    %16 = arith.addf %12, %15 : vector<16x128xf32>
    %c0_12 = arith.constant 0 : index
    %c0_13 = arith.constant 0 : index
    %17 = vector.load %arg7[%c0_12, %c0_13] : memref<16x128xf32, #tpu.memory_space<vmem>>, vector<16x128xf32>
    tpu.vector_store %arg7[%c0_12, %c0_13], %16 {strides = array<i32>} : memref<16x128xf32, #tpu.memory_space<vmem>>, vector<16x128xf32>,
    return
  }
  func.func @transform_0(%arg0: i32, %arg1: i32) -> (i32, i32) {
    %c0_i32 = arith.constant 0 : i32
    %c0_i32_0 = arith.constant 0 : i32
    return %arg0, %c0_i32 : i32, i32
  }
  func.func @transform_1(%arg0: i32, %arg1: i32) -> (i32, i32) {
    %c0_i32 = arith.constant 0 : i32
    %c0_i32_0 = arith.constant 0 : i32
    return %c0_i32, %arg1 : i32, i32
  }
  func.func @transform_2(%arg0: i32, %arg1: i32) -> (i32, i32) {
    %c0_i32 = arith.constant 0 : i32
    %c0_i32_0 = arith.constant 0 : i32
    return %c0_i32, %arg1 : i32, i32
  }
  func.func @transform_3(%arg0: i32, %arg1: i32) -> (i32, i32) {
    %c0_i32 = arith.constant 0 : i32
    %c0_i32_0 = arith.constant 0 : i32
    return %arg1, %c0_i32 : i32, i32
  }
  func.func @transform_4(%arg0: i32, %arg1: i32) -> (i32, i32) {
    %c0_i32 = arith.constant 0 : i32
    %c0_i32_0 = arith.constant 0 : i32
    %c0_i32_1 = arith.constant 0 : i32
    return %c0_i32, %c0_i32_0 : i32, i32
  }
  func.func @transform_5(%arg0: i32, %arg1: i32) -> (i32, i32) {
    %c0_i32 = arith.constant 0 : i32
    %c0_i32_0 = arith.constant 0 : i32
    return %arg0, %c0_i32 : i32, i32
  }
}

</mosaic_0001>

<bundles_post_ra>
// kernel: tpu_custom_call.1
= control target key start
LH: loop header
LB: loop body
LE: loop exit
PB: predicated region body
PF: predicated region fallthrough
CT: control target
= control target key end

     0   :  { %10 = vsyncpa [#allocation3], 0  ;;  %s626_s0 = inlined_call_operand.hbm [shape: f32[16,128], index: 0, kind: input, shape index: {}]   ;;  %s627_s1 = inlined_call_operand.hbm [shape: bf16[128,128], index: 1, kind: input, shape index: {}]   ;;  %s628_s2 = inlined_call_operand.vmem [shape: f32[1,128], index: 2, kind: input, shape index: {}]   ;;  %s629_s3 = inlined_call_operand.hbm [shape: bf16[128,128], index: 3, kind: input, shape index: {}]   ;;  %s630_s4 = inlined_call_operand.vmem [shape: f32[1,128], index: 4, kind: input, shape index: {}]   ;;  %s631_s5 = inlined_call_operand.hbm [shape: f32[16,128], index: 5, kind: output, shape index: {}]  }
   0x1   :  { %11 = vsyncpa [#allocation6], 0 }
   0x2   :  { %12 = vsyncpa [#allocation4], 0  ;;  %s520_s18 = smov [#allocation5]   ;;  %s426_s22 = scalar_lea.hbm %s627_s1, 1024 }
   0x3   :  { %s30_s19 = sshll.u32 %s520_s18, 4  ;;  %p427_p0 = scmp.ne.s32.totalorder %s627_s1, %s426_s22  ;;  %s31_s19 = int_to_ptr.vmem [resolvable:$true] %s30_s19 }
   0x4   :  { %p430_p1 = scmp.lt.u32.totalorder %s426_s22, %s627_s1 }
   0x6   :  { %p432_p2 = pnand %p430_p1, %p427_p0 }
   0x8   :  { %435 = shalt.err (!%p432_p2)
}
   0x9   :  { %s436_s27 = scalar_lea.vmem %s31_s19, 1024  ;;  %p441_p4 = scmp.lt.s32.totalorder %s31_s19, %s31_s19 }
   0xa   :  { %p437_p3 = scmp.ne.s32.totalorder %s31_s19, %s436_s27  ;;  %p442_p5 = scmp.lt.s32.totalorder %s436_s27, %s436_s27 }
   0xc   :  { %p443_p6 = por %p442_p5, %p441_p4 }
   0xe   :  { %p444_p7 = pnand %p443_p6, %p437_p3 }
  0x10   :  { %447 = shalt.err (!%p444_p7)
}
  0x11   :  { %s521_s28 = smov 64   ;;  %s522_s29 = smov 4  }
  0x12   :  { %36 = dma.hbm_to_vmem [thread:$0]  %s627_s1, 1024, %s31_s19, [#allocation6], %s521_s28, %s521_s28, %s522_s29  }
  0x13   :  { %s523_s7 = smov [#allocation2]   ;;  %s448_s11 = scalar_lea.hbm %s626_s0, 256 }
  0x14   :  { %s18_s8 = sshll.u32 %s523_s7, 4  ;;  %p449_p8 = scmp.ne.s32.totalorder %s626_s0, %s448_s11  ;;  %s19_s8 = int_to_ptr.vmem [resolvable:$true] %s18_s8 }
  0x15   :  { %p452_p9 = scmp.lt.u32.totalorder %s448_s11, %s626_s0 }
  0x17   :  { %p454_p10 = pnand %p452_p9, %p449_p8 }
  0x19   :  { %457 = shalt.err (!%p454_p10)
}
  0x1a   :  { %s458_s16 = scalar_lea.vmem %s19_s8, 256  ;;  %p463_p12 = scmp.lt.s32.totalorder %s19_s8, %s19_s8 }
  0x1b   :  { %p459_p11 = scmp.ne.s32.totalorder %s19_s8, %s458_s16  ;;  %p464_p13 = scmp.lt.s32.totalorder %s458_s16, %s458_s16 }
  0x1d   :  { %p465_p0 = por %p464_p13, %p463_p12 }
  0x1f   :  { %p466_p1 = pnand %p465_p0, %p459_p11 }
  0x21   :  { %469 = shalt.err (!%p466_p1)
}
  0x22   :  { %s524_s1 = smov 128   ;;  %s525_s17 = smov 8  }
  0x23   :  { %24 = dma.hbm_to_vmem [thread:$0]  %s626_s0, 256, %s19_s8, [#allocation3], %s524_s1, %s524_s1, %s525_s17  }
  0x24   :  { %s526_s20 = smov [#allocation7]   ;;  %s470_s24 = scalar_lea.hbm %s629_s3, 1024 }
  0x25   :  { %s44_s21 = sshll.u32 %s526_s20, 4  ;;  %p471_p2 = scmp.ne.s32.totalorder %s629_s3, %s470_s24  ;;  %s45_s21 = int_to_ptr.vmem [resolvable:$true] %s44_s21 }
  0x26   :  { %p474_p3 = scmp.lt.u32.totalorder %s470_s24, %s629_s3 }
  0x28   :  { %p476_p4 = pnand %p474_p3, %p471_p2 }
  0x2a   :  { %479 = shalt.err (!%p476_p4)
}
  0x2b   :  { %s480_s6 = scalar_lea.vmem %s45_s21, 1024  ;;  %p485_p6 = scmp.lt.s32.totalorder %s45_s21, %s45_s21 }
  0x2c   :  { %p481_p5 = scmp.ne.s32.totalorder %s45_s21, %s480_s6  ;;  %p486_p7 = scmp.lt.s32.totalorder %s480_s6, %s480_s6 }
  0x2e   :  { %p487_p8 = por %p486_p7, %p485_p6 }
  0x30   :  { %p488_p9 = pnand %p487_p8, %p481_p5 }
  0x32   :  { %491 = shalt.err (!%p488_p9)
}
  0x33   :  { %50 = dma.hbm_to_vmem [thread:$0]  %s629_s3, 1024, %s45_s21, [#allocation6], %s521_s28, %s521_s28, %s522_s29  }
  0x34   :  { %514 = dma.done.wait [#allocation3], 256  }
  0x35   :  { %515 = vsyncadd [#allocation3], 4294967040 }
  0x36   :  { %516 = dma.done.wait [#allocation6], 2048  }
  0x37   :  { %517 = vsyncadd [#allocation6], 4294965248  ;;  %v527_v0 = vmov 0.0   ;;  %vm528_vm0 = vmmov 0   ;;  %v410_v1 = vld [vmem:[#allocation5] sm:$0xff]   ;;  %v411_v2 = vld [vmem:[#allocation5 + $0x8] sm:$0xff]  }
  0x38   :  { %360 = vmatprep.subr.bf16.mxu0 %v527_v0  ;;  %376 = vmatprep.mubr.msk.bf16.mxu0 %vm528_vm0, %v527_v0  ;;  %v412_v3 = vld [vmem:[#allocation5 + $0x10] sm:$0xff]   ;;  %v418_v4 = vld [vmem:[#allocation7] sm:$0xff]   ;;  %v413_v5 = vld [vmem:[#allocation5 + $0x18] sm:$0xff]   ;;  %s529_s9 = smov [#allocation8]  }
  0x39   :  { %380 = vmatprep.subr.bf16.mxu1 %v527_v0  ;;  %396 = vmatprep.mubr.msk.bf16.mxu1 %vm528_vm0, %v527_v0  ;;  %v419_v6 = vld [vmem:[#allocation7 + $0x8] sm:$0xff]   ;;  %v414_v7 = vld [vmem:[#allocation5 + $0x20] sm:$0xff]   ;;  %v420_v8 = vld [vmem:[#allocation7 + $0x10] sm:$0xff]   ;;  %s311_s10 = sshll.u32 %s529_s9, 4  ;;  %s312_s10 = int_to_ptr.vmem [resolvable:$true] %s311_s10 }
  0x3a   :  { %361 = vmatpush3.bf16.msra.mxu0 %v410_v1  ;;  %381 = vmatpush3.bf16.msra.mxu1 %v418_v4  ;;  %v415_v9 = vld [vmem:[#allocation5 + $0x28] sm:$0xff]   ;;  %v421_v10 = vld [vmem:[#allocation7 + $0x18] sm:$0xff]   ;;  %v416_v11 = vld [vmem:[#allocation5 + $0x30] sm:$0xff]   ;;  %p497_p11 = scmp.lt.s32.totalorder %s312_s10, %s312_s10 }
  0x3b   :  { %362 = vmatprep.subr.bf16.mxu0 %v527_v0  ;;  %382 = vmatprep.subr.bf16.mxu1 %v527_v0  ;;  %v422_v12 = vld [vmem:[#allocation7 + $0x20] sm:$0xff]   ;;  %v417_v13 = vld [vmem:[#allocation5 + $0x38] sm:$0xff]   ;;  %v77_v14 = vld [vmem:[#allocation2] sm:$0xff] }
  0x3c   :  { %v78_v15 = vld [vmem:[#allocation2 + $0x8] sm:$0xff]  ;;  %v423_v16 = vld [vmem:[#allocation7 + $0x28] sm:$0xff]   ;;  %v424_v18 = vld [vmem:[#allocation7 + $0x30] sm:$0xff]  }
  0x3d   :  { %v79_v17 = vpack.c.bf16 %v78_v15, %v77_v14  ;;  %v425_v19 = vld [vmem:[#allocation7 + $0x38] sm:$0xff]   ;;  %v325_v20 = vld [vmem:[%s628_s2] ss:$0 sm:$0xff]  ;;  %s492_s2 = scalar_lea.vmem %s312_s10, 256 }
  0x3e   :  { %363 = vmatpush3.bf16.msra.mxu0 %v411_v2  ;;  %383 = vmatpush3.bf16.msra.mxu1 %v419_v6  ;;  %v324_v30 = vld [vmem:[%s630_s4] ss:$0 sm:$0xff]  ;;  %p493_p10 = scmp.ne.s32.totalorder %s312_s10, %s492_s2  ;;  %p498_p12 = scmp.lt.s32.totalorder %s492_s2, %s492_s2 }
  0x3f   :  { %364 = vmatprep.subr.bf16.mxu0 %v527_v0  ;;  %384 = vmatprep.subr.bf16.mxu1 %v527_v0 }
  0x40   :  { %p499_p13 = por %p498_p12, %p497_p11 }
  0x42   :  { %365 = vmatpush3.bf16.msra.mxu0 %v412_v3  ;;  %385 = vmatpush3.bf16.msra.mxu1 %v420_v8  ;;  %p500_p0 = pnand %p499_p13, %p493_p10 }
  0x43   :  { %366 = vmatprep.subr.bf16.mxu0 %v527_v0  ;;  %386 = vmatprep.subr.bf16.mxu1 %v527_v0 }
  0x46   :  { %367 = vmatpush3.bf16.msra.mxu0 %v413_v5  ;;  %387 = vmatpush3.bf16.msra.mxu1 %v421_v10 }
  0x47   :  { %368 = vmatprep.subr.bf16.mxu0 %v527_v0  ;;  %388 = vmatprep.subr.bf16.mxu1 %v527_v0 }
  0x4a   :  { %369 = vmatpush3.bf16.msra.mxu0 %v414_v7  ;;  %389 = vmatpush3.bf16.msra.mxu1 %v422_v12 }
  0x4b   :  { %370 = vmatprep.subr.bf16.mxu0 %v527_v0  ;;  %390 = vmatprep.subr.bf16.mxu1 %v527_v0 }
  0x4e   :  { %371 = vmatpush3.bf16.msra.mxu0 %v415_v9  ;;  %391 = vmatpush3.bf16.msra.mxu1 %v423_v16 }
  0x4f   :  { %372 = vmatprep.subr.bf16.mxu0 %v527_v0  ;;  %392 = vmatprep.subr.bf16.mxu1 %v527_v0 }
  0x52   :  { %373 = vmatpush3.bf16.msra.mxu0 %v416_v11  ;;  %393 = vmatpush3.bf16.msra.mxu1 %v424_v18 }
  0x53   :  { %374 = vmatprep.subr.bf16.mxu0 %v527_v0  ;;  %394 = vmatprep.subr.bf16.mxu1 %v527_v0 }
  0x56   :  { %375 = vmatpush3.bf16.msra.mxu0 %v417_v13  ;;  %395 = vmatpush3.bf16.msra.mxu1 %v425_v19 }
  0x59   :  { %377 = vmatmul.mubr.bf16.vlgmr.msra.gmra.mrb[0].mxu0 %v79_v17 }
 0x12c   :  { %v185_v21 = vpop.f32.mrb[0].mxu0 }
 0x12d   :  { %v186_v22 = vadd.f32 %v325_v20, %v185_v21  ;;  %v378_v23 = vpop.f32.mrb[1].mxu0 }
 0x12e   :  { %v188_v24 = vpop.f32.mrb[2].mxu0 }
 0x12f   :  { %v189_v25 = vadd.f32 %v325_v20, %v188_v24  ;;  %v379_v26 = vpop.f32.mrb[3].mxu0  ;;  %v192_v27 = vmax.f32 %v186_v22, 0.0 }
 0x131   :  { %v193_v28 = vmax.f32 %v189_v25, 0.0 }
 0x133   :  { %v196_v29 = vpack.c.bf16 %v193_v28, %v192_v27 }
 0x135   :  { %397 = vmatmul.mubr.bf16.vlgmr.msra.gmra.mrb[0].mxu1 %v196_v29 }
 0x208   :  { %v295_v31 = vpop.f32.mrb[0].mxu1 }
 0x209   :  { %v302_v32 = vadd.f32 %v324_v30, %v295_v31  ;;  %v398_v33 = vpop.f32.mrb[1].mxu1 }
 0x20a   :  { %v298_v34 = vpop.f32.mrb[2].mxu1 }
 0x20b   :  { %304 = vst [vmem:[#allocation8] sm:$0xff] %v302_v32  ;;  %v303_v35 = vadd.f32 %v324_v30, %v298_v34  ;;  %v399_v36 = vpop.f32.mrb[3].mxu1 }
 0x20d   :  { %305 = vst [vmem:[#allocation8 + $0x8] sm:$0xff] %v303_v35 }
 0x20e   :  { %503 = shalt.err (!%p500_p0)
}
 0x20f   :  { %s504_s12 = scalar_lea.hbm %s631_s5, 256 }
 0x210   :  { %p505_p1 = scmp.ne.s32.totalorder %s631_s5, %s504_s12  ;;  %p508_p2 = scmp.lt.u32.totalorder %s504_s12, %s631_s5 }
 0x212   :  { %p510_p3 = pnand %p508_p2, %p505_p1 }
 0x214   :  { %513 = shalt.err (!%p510_p3)
}
 0x215   :  { %317 = dma.vmem_to_hbm [thread:$0]  %s312_s10, 256, %s631_s5, [#allocation4], %s524_s1, %s524_s1, %s525_s17  }
 0x216   :  { %518 = dma.done.wait [#allocation4], 256  }
 0x217   :  { %519 = vsyncadd [#allocation4], 4294967040 }
 0x218   :  { %321 = vsyncpa [#allocation3], 1 }
 0x219   :  { %322 = vsyncpa [#allocation6], 1 }
 0x21a   :  { %323 = vsyncpa [#allocation4], 1 }

</bundles_post_ra>
